<compile_context>
chip_gen: v7x
topology: tpu7x:2x2x1
jax: 0.10.0
libtpu: 0.0.40
codegen_flags: <defaults>
</compile_context>

<pallas_src>
import functools

import jax
import jax.numpy as jnp
from jax.experimental import pallas as pl
from jax.experimental.pallas import tpu as pltpu

HIDDEN = 100          # logical hidden width of d_fc1 / d_bn1
H_PAD = 128           # lane-dense padded hidden width
NUM_CLASSES = 2       # logical output width of d_fc2
OUT_PAD = 128         # lane-dense padded output width
BN_EPS = 1e-5

# Conservative scoped-VMEM budget that fits every generation (v7x physical VMEM
# is 64 MiB; v5e/v6e have 128 MiB).
_VMEM_LIMIT = 48 * 1024 * 1024


def _round_up(n, m):
    return (n + m - 1) // m * m


def _plan(B, F, block_b):
    """Pick (tile_b, b_pad, resident_h) against the VMEM budget."""
    budget = _VMEM_LIMIT - (4 << 20)                       # headroom
    # Resident weights/vectors (constant index_maps -> no per-tile re-DMA).
    w_bytes = F * H_PAD * 2 + H_PAD * OUT_PAD * 2 + 2 * H_PAD * 4 + OUT_PAD * 4

    def tile_bytes(t):                                     # double-buffered x + out tiles
        return 2 * t * F * 4 + 2 * t * OUT_PAD * 4

    tb = max(8, min(_round_up(block_b, 8), _round_up(B, 8)))
    while tb > 8 and w_bytes + tile_bytes(tb) > budget:
        tb = max(8, _round_up(tb // 2, 8))
    b_pad = _round_up(B, tb)
    h_bytes = b_pad * H_PAD * 4                            # resident fc1 activations (f32)
    resident_h = w_bytes + tile_bytes(tb) + h_bytes <= budget
    return tb, b_pad, resident_h


def _domain_classifier_kernel(x_ref, w1_ref, gamma_ref, beta_ref, w2_ref, b2_ref,
                              o_ref, sum_ref, sqsum_ref, *h_scratch,
                              true_batch, tile_b):
    resident_h = bool(h_scratch)
    h_ref = h_scratch[0] if resident_h else None

    phase = pl.program_id(0)   # 0: fc1 + BN-stat accumulation, 1: normalize + fc2
    i = pl.program_id(1)       # batch-tile index

    @pl.when(jnp.logical_and(phase == 0, i == 0))
    def _init_stats():
        sum_ref[...] = jnp.zeros_like(sum_ref)
        sqsum_ref[...] = jnp.zeros_like(sqsum_ref)

    def fc1():
        # In-kernel bf16 cast (free VPU op under the MXU), f32 accumulation.
        # b1 is omitted: it is cancelled exactly by the training-mode BatchNorm
        # mean subtraction.
        return jnp.dot(x_ref[...].astype(jnp.bfloat16), w1_ref[...],
                       preferred_element_type=jnp.float32)

    @pl.when(phase == 0)
    def _accumulate_stats():
        h = fc1()
        if resident_h:
            h_ref[pl.ds(pl.multiple_of(i * tile_b, 8), tile_b), :] = h
        # Rows >= true_batch are wrapper zero-padding; mask them out of the stats.
        row = jax.lax.broadcasted_iota(jnp.int32, (tile_b, 1), 0) + i * tile_b
        hm = jnp.where(row < true_batch, h, 0.0)
        # Per-feature (column) sums in f32 on the VPU/XLU: keeps the MXU free and
        # avoids the multi-pass f32-matmul penalty on v5e.
        sum_ref[...] += jnp.sum(hm, axis=0, keepdims=True)
        sqsum_ref[...] += jnp.sum(hm * hm, axis=0, keepdims=True)
        # No output store in phase 0 (output block index is pinned to 0 here).

    @pl.when(phase == 1)
    def _normalize_and_fc2():
        @pl.when(i == 0)
        def _fold_bn():
            # Fold BatchNorm (training-mode batch stats, biased variance) into a
            # per-feature scale/shift once; reuse the stats scratch to hold them.
            # NOTE: one-pass E[h^2]-E[h]^2 can lose precision when |mean| >> std;
            # acceptable here since b1 is dropped and h is bf16-matmul output.
            inv_n = 1.0 / float(true_batch)
            mean = sum_ref[...] * inv_n
            var = jnp.maximum(sqsum_ref[...] * inv_n - mean * mean, 0.0)
            scale = gamma_ref[...] * jax.lax.rsqrt(var + BN_EPS)
            sum_ref[...] = scale
            sqsum_ref[...] = beta_ref[...] - mean * scale

        if resident_h:
            h = h_ref[pl.ds(pl.multiple_of(i * tile_b, 8), tile_b), :]
        else:
            h = fc1()   # recompute fallback for batches too large for VMEM
        hn = jnp.maximum(h * sum_ref[...] + sqsum_ref[...], 0.0)   # d_bn1 + d_relu1
        # d_fc2: bf16 operands, f32 accumulation; lane-dense (tb, 128) store.
        o_ref[...] = (jnp.dot(hn.astype(w2_ref.dtype), w2_ref[...],
                              preferred_element_type=jnp.float32)
                      + b2_ref[...]).astype(o_ref.dtype)


def prepare_params(params):
    """One-time parameter prep: transpose to (in, out), zero-pad to lane-dense
    widths, cast matmul operands to bf16.  b1 is dropped (cancelled by BN)."""
    w1, b1, gamma, beta, w2, b2 = params   # PyTorch layouts, f32
    del b1
    F = w1.shape[1]
    w1p = jnp.zeros((F, H_PAD), jnp.bfloat16).at[:, :HIDDEN].set(
        w1.T.astype(jnp.bfloat16))
    gammap = jnp.zeros((1, H_PAD), jnp.float32).at[:, :HIDDEN].set(gamma)
    betap = jnp.zeros((1, H_PAD), jnp.float32).at[:, :HIDDEN].set(beta)
    w2p = jnp.zeros((H_PAD, OUT_PAD), jnp.bfloat16).at[:HIDDEN, :NUM_CLASSES].set(
        w2.T.astype(jnp.bfloat16))
    b2p = jnp.zeros((1, OUT_PAD), jnp.float32).at[:, :NUM_CLASSES].set(b2)
    return (w1p, gammap, betap, w2p, b2p)


@functools.partial(jax.jit, static_argnames=("block_b",))
def domain_classifier_forward(x, prepared_params, *, block_b=512):
    """Fused DomainClassifier forward.  x: (B, F) f32.  Returns (B, 2) f32."""
    w1p, gammap, betap, w2p, b2p = prepared_params
    B, F = x.shape
    tb, b_pad, resident_h = _plan(B, F, block_b)
    n_tiles = b_pad // tb
    xp = x if b_pad == B else jnp.pad(x, ((0, b_pad - B), (0, 0)))

    kernel = functools.partial(_domain_classifier_kernel, true_batch=B, tile_b=tb)

    if resident_h:
        # Phase 1 reads h from VMEM, so keep the x block index pinned (a single
        # extra tile-0 DMA at the phase transition, nothing more).
        x_map = lambda p, i: ((1 - p) * i, 0)
    else:
        x_map = lambda p, i: (i, 0)            # recompute path re-streams x

    scratch = [pltpu.VMEM((1, H_PAD), jnp.float32),      # sum  -> later: scale
               pltpu.VMEM((1, H_PAD), jnp.float32)]      # sqsum -> later: shift
    if resident_h:
        scratch.append(pltpu.VMEM((b_pad, H_PAD), jnp.float32))   # resident fc1 out

    grid_spec = pltpu.PrefetchScalarGridSpec(
        num_scalar_prefetch=0,
        grid=(2, n_tiles),                                        # (BN phase, batch tile)
        in_specs=[
            pl.BlockSpec((tb, F), x_map),                         # x tile (f32)
            pl.BlockSpec((F, H_PAD), lambda p, i: (0, 0)),        # w1 (resident)
            pl.BlockSpec((1, H_PAD), lambda p, i: (0, 0)),        # gamma
            pl.BlockSpec((1, H_PAD), lambda p, i: (0, 0)),        # beta
            pl.BlockSpec((H_PAD, OUT_PAD), lambda p, i: (0, 0)),  # w2 (resident)
            pl.BlockSpec((1, OUT_PAD), lambda p, i: (0, 0)),      # b2
        ],
        # Phase 0: output block index stays 0 and is never written, so logits are
        # written back to HBM exactly once (during phase 1).
        out_specs=pl.BlockSpec((tb, OUT_PAD), lambda p, i: (p * i, 0)),
        scratch_shapes=scratch,
    )

    fc1_passes = 1 if resident_h else 2
    cost = pl.CostEstimate(
        flops=int(2 * fc1_passes * b_pad * F * H_PAD      # fc1
                  + 2 * b_pad * H_PAD * OUT_PAD           # fc2
                  + 4 * b_pad * H_PAD),                   # stats sums / squares
        transcendentals=int(H_PAD),                       # rsqrt (once)
        bytes_accessed=int(fc1_passes * b_pad * F * 4     # x stream(s), f32
                           + F * H_PAD * 2 + H_PAD * OUT_PAD * 2
                           + b_pad * OUT_PAD * 4),        # single output writeback
    )

    out = pl.pallas_call(
        kernel,
        out_shape=jax.ShapeDtypeStruct((b_pad, OUT_PAD), jnp.float32),
        grid_spec=grid_spec,
        compiler_params=pltpu.CompilerParams(
            # Both axes sequential: every batch tile updates the shared BN-stats
            # scratch and phase 1 depends on all of phase 0.
            # TODO(synk): on v7x a megacore-'parallel' batch axis would need a
            # cross-core stats reduction (VMEM_SHARED/CMEM + core_barrier); kept
            # single-core sequential here.
            dimension_semantics=("arbitrary", "arbitrary"),
            vmem_limit_bytes=_VMEM_LIMIT,
        ),
        cost_estimate=cost,
    )(xp, w1p, gammap, betap, w2p, b2p)

    return out[:B, :NUM_CLASSES]


def init_params(key, num_ftrs, hidden=HIDDEN, num_classes=NUM_CLASSES):
    """PyTorch-default-style init, in PyTorch layouts ((out, in) weights)."""
    k1, k2, k3, k4 = jax.random.split(key, 4)
    bound1 = 1.0 / jnp.sqrt(float(num_ftrs))
    w1 = jax.random.uniform(k1, (hidden, num_ftrs), jnp.float32, -bound1, bound1)
    b1 = jax.random.uniform(k2, (hidden,), jnp.float32, -bound1, bound1)
    gamma = jnp.ones((hidden,), jnp.float32)   # BatchNorm1d weight
    beta = jnp.zeros((hidden,), jnp.float32)   # BatchNorm1d bias
    bound2 = 1.0 / jnp.sqrt(float(hidden))
    w2 = jax.random.uniform(k3, (num_classes, hidden), jnp.float32, -bound2, bound2)
    b2 = jax.random.uniform(k4, (num_classes,), jnp.float32, -bound2, bound2)
    return (w1, b1, gamma, beta, w2, b2)


def reference_forward(x, params):
    """Pure-JAX reference (keeps b1; it cancels exactly under training-mode BN)."""
    w1, b1, gamma, beta, w2, b2 = params
    h = jnp.dot(x.astype(jnp.bfloat16), w1.T.astype(jnp.bfloat16),
                preferred_element_type=jnp.float32) + b1[None, :]
    mean = jnp.mean(h, axis=0, keepdims=True)
    var = jnp.mean((h - mean) ** 2, axis=0, keepdims=True)
    h = (h - mean) / jnp.sqrt(var + BN_EPS)
    h = h * gamma[None, :] + beta[None, :]
    h = jnp.maximum(h, 0.0)
    return jnp.dot(h.astype(jnp.bfloat16), w2.T.astype(jnp.bfloat16),
                   preferred_element_type=jnp.float32) + b2[None, :]


if __name__ == "__main__":
    key = jax.random.PRNGKey(0)
    kx, kp, kx2 = jax.random.split(key, 3)

    # Small shapes consistent with the module: DomainClassifier(num_ftrs=32), batch 8.
    B, num_ftrs = 8, 32
    params = init_params(kp, num_ftrs)
    prepared = prepare_params(params)
    x = jax.random.normal(kx, (B, num_ftrs), jnp.float32)

    out = jax.block_until_ready(domain_classifier_forward(x, prepared))
    ref = reference_forward(x, params)
    assert out.shape == (B, NUM_CLASSES)
    assert jnp.allclose(out, ref, atol=1e-2, rtol=1e-2), \
        float(jnp.max(jnp.abs(out - ref)))

    # Second case: batch not a multiple of the sublane tile (exercises the
    # padded-row masking in the BatchNorm statistics).
    B2, F2 = 12, 48
    params2 = init_params(jax.random.fold_in(kp, 1), F2)
    x2 = jax.random.normal(kx2, (B2, F2), jnp.float32)
    out2 = jax.block_until_ready(
        domain_classifier_forward(x2, prepare_params(params2)))
    ref2 = reference_forward(x2, params2)
    assert out2.shape == (B2, NUM_CLASSES)
    assert jnp.allclose(out2, ref2, atol=1e-2, rtol=1e-2), \
        float(jnp.max(jnp.abs(out2 - ref2)))

    print("KERNEL_OK")
</pallas_src>

<mosaic_0001>
module attributes {stable_mosaic.version = 11 : i64} {
  func.func @_domain_classifier_kernel(%arg0: i32, %arg1: i32, %arg2: memref<8x32xf32, #tpu.memory_space<vmem>>, %arg3: memref<32x128xbf16, #tpu.memory_space<vmem>>, %arg4: memref<1x128xf32, #tpu.memory_space<vmem>>, %arg5: memref<1x128xf32, #tpu.memory_space<vmem>>, %arg6: memref<128x128xbf16, #tpu.memory_space<vmem>>, %arg7: memref<1x128xf32, #tpu.memory_space<vmem>>, %arg8: memref<8x128xf32, #tpu.memory_space<vmem>>, %arg9: memref<1x128xf32, #tpu.memory_space<vmem>>, %arg10: memref<1x128xf32, #tpu.memory_space<vmem>>, %arg11: memref<8x128xf32, #tpu.memory_space<vmem>>) attributes {dimension_semantics = [#tpu.dimension_semantics<arbitrary>, #tpu.dimension_semantics<arbitrary>], iteration_bounds = array<i64: 2, 1>, scalar_prefetch = 0 : i64, scratch_operands = 3 : i64, tpu.core_type = #tpu.core_type<tc>, window_params = [{transform_indices = @transform_0, window_bounds = array<i64: 8, 32>}, {pipeline_mode = #tpu.pipeline_mode<synchronous>, transform_indices = @transform_1, window_bounds = array<i64: 32, 128>}, {pipeline_mode = #tpu.pipeline_mode<synchronous>, transform_indices = @transform_2, window_bounds = array<i64: 1, 128>}, {pipeline_mode = #tpu.pipeline_mode<synchronous>, transform_indices = @transform_3, window_bounds = array<i64: 1, 128>}, {pipeline_mode = #tpu.pipeline_mode<synchronous>, transform_indices = @transform_4, window_bounds = array<i64: 128, 128>}, {pipeline_mode = #tpu.pipeline_mode<synchronous>, transform_indices = @transform_5, window_bounds = array<i64: 1, 128>}, {transform_indices = @transform_6, window_bounds = array<i64: 8, 128>}]} {
    %c0_i32 = arith.constant 0 : i32
    %0 = arith.cmpi eq, %arg0, %c0_i32 : i32
    %c0_i32_0 = arith.constant 0 : i32
    %1 = arith.cmpi eq, %arg1, %c0_i32_0 : i32
    %2 = arith.andi %0, %1 : i1
    %3 = arith.extui %2 : i1 to i32
    %c0_i32_1 = arith.constant 0 : i32
    %4 = arith.cmpi ne, %3, %c0_i32_1 : i32
    scf.if %4 {
      %cst = arith.constant 0.000000e+00 : f32
      %11 = vector.broadcast %cst : f32 to vector<1x128xf32>
      %c0 = arith.constant 0 : index
      %c0_5 = arith.constant 0 : index
      %12 = vector.load %arg9[%c0, %c0_5] : memref<1x128xf32, #tpu.memory_space<vmem>>, vector<1x128xf32>
      tpu.vector_store %arg9[%c0, %c0_5], %11 {strides = array<i32>} : memref<1x128xf32, #tpu.memory_space<vmem>>, vector<1x128xf32>,
      %cst_6 = arith.constant 0.000000e+00 : f32
      %13 = vector.broadcast %cst_6 : f32 to vector<1x128xf32>
      %c0_7 = arith.constant 0 : index
      %c0_8 = arith.constant 0 : index
      %14 = vector.load %arg10[%c0_7, %c0_8] : memref<1x128xf32, #tpu.memory_space<vmem>>, vector<1x128xf32>
      tpu.vector_store %arg10[%c0_7, %c0_8], %13 {strides = array<i32>} : memref<1x128xf32, #tpu.memory_space<vmem>>, vector<1x128xf32>,
    } else {
    }
    %c0_i32_2 = arith.constant 0 : i32
    %5 = arith.cmpi eq, %arg0, %c0_i32_2 : i32
    %6 = arith.extui %5 : i1 to i32
    %c0_i32_3 = arith.constant 0 : i32
    %7 = arith.cmpi ne, %6, %c0_i32_3 : i32
    scf.if %7 {
      %c0 = arith.constant 0 : index
      %c0_5 = arith.constant 0 : index
      %11 = vector.load %arg2[%c0, %c0_5] : memref<8x32xf32, #tpu.memory_space<vmem>>, vector<8x32xf32>
      %12 = arith.truncf %11 : vector<8x32xf32> to vector<8x32xbf16>
      %c0_6 = arith.constant 0 : index
      %c0_7 = arith.constant 0 : index
      %13 = vector.load %arg3[%c0_6, %c0_7] : memref<32x128xbf16, #tpu.memory_space<vmem>>, vector<32x128xbf16>
      %cst = arith.constant dense<0.000000e+00> : vector<8x128xf32>
      %14 = tpu.matmul %12, %13, %cst {dimension_numbers = #tpu.dot_dimension_numbers<[1], [0], [0], [1], [0, 0, 1, 1], [], []>} : vector<8x32xbf16>, vector<32x128xbf16>, vector<8x128xf32> -> vector<8x128xf32>
      %c8_i32 = arith.constant 8 : i32
      %15 = arith.muli %arg1, %c8_i32 : i32
      %16 = tpu.assume_multiple %15, 8 : i32
      %17 = arith.index_cast %16 : i32 to index
      %c0_8 = arith.constant 0 : index
      %18 = vector.load %arg11[%17, %c0_8] : memref<8x128xf32, #tpu.memory_space<vmem>>, vector<8x128xf32>
      tpu.vector_store %arg11[%17, %c0_8], %14 {strides = array<i32>} : memref<8x128xf32, #tpu.memory_space<vmem>>, vector<8x128xf32>,
      %19 = tpu.iota {dimensions = array<i32: 0>} : vector<8x1xi32>
      %c8_i32_9 = arith.constant 8 : i32
      %20 = arith.muli %arg1, %c8_i32_9 : i32
      %21 = vector.broadcast %20 : i32 to vector<8x1xi32>
      %22 = arith.addi %19, %21 : vector<8x1xi32>
      %c8_i32_10 = arith.constant 8 : i32
      %23 = vector.broadcast %c8_i32_10 : i32 to vector<8x1xi32>
      %24 = arith.cmpi slt, %22, %23 : vector<8x1xi32>
      %cst_11 = arith.constant 0.000000e+00 : f32
      %25 = vector.shape_cast %24 : vector<8x1xi1> to vector<8x1xi1>
      %26 = vector.broadcast %25 : vector<8x1xi1> to vector<8x128xi1>
      %27 = vector.broadcast %cst_11 : f32 to vector<8x128xf32>
      %28 = arith.select %26, %14, %27 : vector<8x128xi1>, vector<8x128xf32>
      %c0_12 = arith.constant 0 : index
      %c0_13 = arith.constant 0 : index
      %29 = vector.load %arg9[%c0_12, %c0_13] : memref<1x128xf32, #tpu.memory_space<vmem>>, vector<1x128xf32>
      %cst_14 = arith.constant dense<0.000000e+00> : vector<128xf32>
      %30 = vector.multi_reduction <add>, %28, %cst_14 [0] : vector<8x128xf32> to vector<128xf32>
      %31 = vector.shape_cast %30 : vector<128xf32> to vector<1x128xf32>
      %32 = arith.addf %29, %31 : vector<1x128xf32>
      %c0_15 = arith.constant 0 : index
      %c0_16 = arith.constant 0 : index
      %33 = vector.load %arg9[%c0_15, %c0_16] : memref<1x128xf32, #tpu.memory_space<vmem>>, vector<1x128xf32>
      tpu.vector_store %arg9[%c0_15, %c0_16], %32 {strides = array<i32>} : memref<1x128xf32, #tpu.memory_space<vmem>>, vector<1x128xf32>,
      %c0_17 = arith.constant 0 : index
      %c0_18 = arith.constant 0 : index
      %34 = vector.load %arg10[%c0_17, %c0_18] : memref<1x128xf32, #tpu.memory_space<vmem>>, vector<1x128xf32>
      %35 = arith.mulf %28, %28 : vector<8x128xf32>
      %cst_19 = arith.constant dense<0.000000e+00> : vector<128xf32>
      %36 = vector.multi_reduction <add>, %35, %cst_19 [0] : vector<8x128xf32> to vector<128xf32>
      %37 = vector.shape_cast %36 : vector<128xf32> to vector<1x128xf32>
      %38 = arith.addf %34, %37 : vector<1x128xf32>
      %c0_20 = arith.constant 0 : index
      %c0_21 = arith.constant 0 : index
      %39 = vector.load %arg10[%c0_20, %c0_21] : memref<1x128xf32, #tpu.memory_space<vmem>>, vector<1x128xf32>
      tpu.vector_store %arg10[%c0_20, %c0_21], %38 {strides = array<i32>} : memref<1x128xf32, #tpu.memory_space<vmem>>, vector<1x128xf32>,
    } else {
    }
    %c1_i32 = arith.constant 1 : i32
    %8 = arith.cmpi eq, %arg0, %c1_i32 : i32
    %9 = arith.extui %8 : i1 to i32
    %c0_i32_4 = arith.constant 0 : i32
    %10 = arith.cmpi ne, %9, %c0_i32_4 : i32
    scf.if %10 {
      %c0_i32_5 = arith.constant 0 : i32
      %11 = arith.cmpi eq, %arg1, %c0_i32_5 : i32
      %12 = arith.extui %11 : i1 to i32
      %c0_i32_6 = arith.constant 0 : i32
      %13 = arith.cmpi ne, %12, %c0_i32_6 : i32
      scf.if %13 {
        %c0_18 = arith.constant 0 : index
        %c0_19 = arith.constant 0 : index
        %33 = vector.load %arg9[%c0_18, %c0_19] : memref<1x128xf32, #tpu.memory_space<vmem>>, vector<1x128xf32>
        %cst_20 = arith.constant 1.250000e-01 : f32
        %34 = vector.broadcast %cst_20 : f32 to vector<1x128xf32>
        %35 = arith.mulf %33, %34 : vector<1x128xf32>
        %c0_21 = arith.constant 0 : index
        %c0_22 = arith.constant 0 : index
        %36 = vector.load %arg10[%c0_21, %c0_22] : memref<1x128xf32, #tpu.memory_space<vmem>>, vector<1x128xf32>
        %cst_23 = arith.constant 1.250000e-01 : f32
        %37 = vector.broadcast %cst_23 : f32 to vector<1x128xf32>
        %38 = arith.mulf %36, %37 : vector<1x128xf32>
        %39 = arith.mulf %35, %35 : vector<1x128xf32>
        %40 = arith.subf %38, %39 : vector<1x128xf32>
        %cst_24 = arith.constant 0.000000e+00 : f32
        %41 = vector.broadcast %cst_24 : f32 to vector<1x128xf32>
        %42 = arith.maximumf %40, %41 : vector<1x128xf32>
        %c0_25 = arith.constant 0 : index
        %c0_26 = arith.constant 0 : index
        %43 = vector.load %arg4[%c0_25, %c0_26] : memref<1x128xf32, #tpu.memory_space<vmem>>, vector<1x128xf32>
        %cst_27 = arith.constant 9.99999974E-6 : f32
        %44 = vector.broadcast %cst_27 : f32 to vector<1x128xf32>
        %45 = arith.addf %42, %44 : vector<1x128xf32>
        %46 = math.rsqrt %45 : vector<1x128xf32>
        %47 = arith.mulf %43, %46 : vector<1x128xf32>
        %c0_28 = arith.constant 0 : index
        %c0_29 = arith.constant 0 : index
        %48 = vector.load %arg9[%c0_28, %c0_29] : memref<1x128xf32, #tpu.memory_space<vmem>>, vector<1x128xf32>
        tpu.vector_store %arg9[%c0_28, %c0_29], %47 {strides = array<i32>} : memref<1x128xf32, #tpu.memory_space<vmem>>, vector<1x128xf32>,
        %c0_30 = arith.constant 0 : index
        %c0_31 = arith.constant 0 : index
        %49 = vector.load %arg5[%c0_30, %c0_31] : memref<1x128xf32, #tpu.memory_space<vmem>>, vector<1x128xf32>
        %50 = arith.mulf %35, %47 : vector<1x128xf32>
        %51 = arith.subf %49, %50 : vector<1x128xf32>
        %c0_32 = arith.constant 0 : index
        %c0_33 = arith.constant 0 : index
        %52 = vector.load %arg10[%c0_32, %c0_33] : memref<1x128xf32, #tpu.memory_space<vmem>>, vector<1x128xf32>
        tpu.vector_store %arg10[%c0_32, %c0_33], %51 {strides = array<i32>} : memref<1x128xf32, #tpu.memory_space<vmem>>, vector<1x128xf32>,
      } else {
      }
      %c8_i32 = arith.constant 8 : i32
      %14 = arith.muli %arg1, %c8_i32 : i32
      %15 = tpu.assume_multiple %14, 8 : i32
      %16 = arith.index_cast %15 : i32 to index
      %c0 = arith.constant 0 : index
      %17 = vector.load %arg11[%16, %c0] : memref<8x128xf32, #tpu.memory_space<vmem>>, vector<8x128xf32>
      %c0_7 = arith.constant 0 : index
      %c0_8 = arith.constant 0 : index
      %18 = vector.load %arg9[%c0_7, %c0_8] : memref<1x128xf32, #tpu.memory_space<vmem>>, vector<1x128xf32>
      %19 = vector.broadcast %18 : vector<1x128xf32> to vector<8x128xf32>
      %20 = arith.mulf %17, %19 : vector<8x128xf32>
      %c0_9 = arith.constant 0 : index
      %c0_10 = arith.constant 0 : index
      %21 = vector.load %arg10[%c0_9, %c0_10] : memref<1x128xf32, #tpu.memory_space<vmem>>, vector<1x128xf32>
      %22 = vector.broadcast %21 : vector<1x128xf32> to vector<8x128xf32>
      %23 = arith.addf %20, %22 : vector<8x128xf32>
      %cst = arith.constant 0.000000e+00 : f32
      %24 = vector.broadcast %cst : f32 to vector<8x128xf32>
      %25 = arith.maximumf %23, %24 : vector<8x128xf32>
      %26 = arith.truncf %25 : vector<8x128xf32> to vector<8x128xbf16>
      %c0_11 = arith.constant 0 : index
      %c0_12 = arith.constant 0 : index
      %27 = vector.load %arg6[%c0_11, %c0_12] : memref<128x128xbf16, #tpu.memory_space<vmem>>, vector<128x128xbf16>
      %cst_13 = arith.constant dense<0.000000e+00> : vector<8x128xf32>
      %28 = tpu.matmul %26, %27, %cst_13 {dimension_numbers = #tpu.dot_dimension_numbers<[1], [0], [0], [1], [0, 0, 1, 1], [], []>} : vector<8x128xbf16>, vector<128x128xbf16>, vector<8x128xf32> -> vector<8x128xf32>
      %c0_14 = arith.constant 0 : index
      %c0_15 = arith.constant 0 : index
      %29 = vector.load %arg7[%c0_14, %c0_15] : memref<1x128xf32, #tpu.memory_space<vmem>>, vector<1x128xf32>
      %30 = vector.broadcast %29 : vector<1x128xf32> to vector<8x128xf32>
      %31 = arith.addf %28, %30 : vector<8x128xf32>
      %c0_16 = arith.constant 0 : index
      %c0_17 = arith.constant 0 : index
      %32 = vector.load %arg8[%c0_16, %c0_17] : memref<8x128xf32, #tpu.memory_space<vmem>>, vector<8x128xf32>
      tpu.vector_store %arg8[%c0_16, %c0_17], %31 {strides = array<i32>} : memref<8x128xf32, #tpu.memory_space<vmem>>, vector<8x128xf32>,
    } else {
    }
    return
  }
  func.func @transform_0(%arg0: i32, %arg1: i32) -> (i32, i32) {
    %c1_i32 = arith.constant 1 : i32
    %0 = arith.subi %c1_i32, %arg0 : i32
    %1 = arith.muli %0, %arg1 : i32
    %c0_i32 = arith.constant 0 : i32
    %c0_i32_0 = arith.constant 0 : i32
    return %1, %c0_i32 : i32, i32
  }
  func.func @transform_1(%arg0: i32, %arg1: i32) -> (i32, i32) {
    %c0_i32 = arith.constant 0 : i32
    %c0_i32_0 = arith.constant 0 : i32
    %c0_i32_1 = arith.constant 0 : i32
    return %c0_i32, %c0_i32_0 : i32, i32
  }
  func.func @transform_2(%arg0: i32, %arg1: i32) -> (i32, i32) {
    %c0_i32 = arith.constant 0 : i32
    %c0_i32_0 = arith.constant 0 : i32
    %c0_i32_1 = arith.constant 0 : i32
    return %c0_i32, %c0_i32_0 : i32, i32
  }
  func.func @transform_3(%arg0: i32, %arg1: i32) -> (i32, i32) {
    %c0_i32 = arith.constant 0 : i32
    %c0_i32_0 = arith.constant 0 : i32
    %c0_i32_1 = arith.constant 0 : i32
    return %c0_i32, %c0_i32_0 : i32, i32
  }
  func.func @transform_4(%arg0: i32, %arg1: i32) -> (i32, i32) {
    %c0_i32 = arith.constant 0 : i32
    %c0_i32_0 = arith.constant 0 : i32
    %c0_i32_1 = arith.constant 0 : i32
    return %c0_i32, %c0_i32_0 : i32, i32
  }
  func.func @transform_5(%arg0: i32, %arg1: i32) -> (i32, i32) {
    %c0_i32 = arith.constant 0 : i32
    %c0_i32_0 = arith.constant 0 : i32
    %c0_i32_1 = arith.constant 0 : i32
    return %c0_i32, %c0_i32_0 : i32, i32
  }
  func.func @transform_6(%arg0: i32, %arg1: i32) -> (i32, i32) {
    %0 = arith.muli %arg0, %arg1 : i32
    %c0_i32 = arith.constant 0 : i32
    %c0_i32_0 = arith.constant 0 : i32
    return %0, %c0_i32 : i32, i32
  }
}

</mosaic_0001>

<bundles_post_ra>
// kernel: domain_classifier_forward.1
= control target key start
LH: loop header
LB: loop body
LE: loop exit
PB: predicated region body
PF: predicated region fallthrough
CT: control target
= control target key end

     0   :  { %11 = vsyncpa [#allocation6], 0  ;;  %s1127_s0 = inlined_call_operand.hbm [shape: f32[8,32], index: 0, kind: input, shape index: {}]   ;;  %s1128_s1 = inlined_call_operand.hbm [shape: bf16[32,128], index: 1, kind: input, shape index: {}]   ;;  %s1129_s2 = inlined_call_operand.vmem [shape: f32[1,128], index: 2, kind: input, shape index: {}]   ;;  %s1130_s3 = inlined_call_operand.vmem [shape: f32[1,128], index: 3, kind: input, shape index: {}]   ;;  %s1131_s4 = inlined_call_operand.hbm [shape: bf16[128,128], index: 4, kind: input, shape index: {}]   ;;  %s1132_s5 = inlined_call_operand.vmem [shape: f32[1,128], index: 5, kind: input, shape index: {}]   ;;  %s1133_s6 = inlined_call_operand.vmem [shape: f32[8,128], index: 6, kind: output, shape index: {}]  }
   0x1   :  { %13 = vsyncpa [#allocation6 + $0x1], 0 }
   0x2   :  { %14 = vsyncpa [#allocation8], 0  ;;  %s990_s21 = smov 0   ;;  %s992_s22 = smov 0  }
   0x3   :  { %s994_s23 = smov 0  }
   0x4 LB: > { %s680_s24 = sadd.s32 4294967295, %s943_s23   ;;  %s32_s25 = sadd.s32 1, %s939_s22  ;;  %s943_s23 = sphi %s994_s23, %s20_s23   ;;  %s939_s22 = sphi %s992_s22, %s1145_s22   ;;  %s935_s21 = sphi %s990_s21, %s1144_s21  }
   0x5   : > { %p34_p0 = scmp.ge.s32.totalorder %s32_s25, 2  ;;  %p682_p1 = scmp.ge.s32.totalorder %s943_s23, 1 }
   0x6   : > { %p200_p2 = scmp.lt.s32.totalorder %s943_s23, 3  ;;  %p1015_p4 = scmp.eq.s32.totalorder %s680_s24, 0 }
   0x7   : > { %s1147_s25 = smov (%p34_p0, %s32_s25), 0  ;;  %s945_s28 = smov [#allocation7]  }
   0x8   : > { %p1011_p3 = pnand %p682_p1, %p200_p2  ;;  %s212_s29 = sshll.u32 %s945_s28, 4  ;;  %s213_s29 = int_to_ptr.vmem [resolvable:$true] %s212_s29 }
   0x9   : > { %s1138_s27 = scalar_select %p1015_p4, 1, 0 }
   0xa   : > { %s1137_s26 = scalar_select %p1011_p3, 1, 0 }
   0xb   : > { %p765_p5 = pneg %p1011_p3  ;;  %s946_s7 = smov [#allocation9]  }
   0xc   : > { %s231_s8 = sshll.u32 %s946_s7, 4  ;;  %s829_s11 = scalar_lea.hbm %s1128_s1, 256  ;;  %s232_s8 = int_to_ptr.vmem [resolvable:$true] %s231_s8 }
   0xd   : > { %p1023_p6 = pnand %p1015_p4, %p765_p5  ;;  %p830_p7 = scmp.ne.s32.totalorder %s1128_s1, %s829_s11 }
   0xe   : > { %p836_p11 = scmp.lt.u32.totalorder %s829_s11, %s1128_s1 }
   0xf   : > { %p831_p8 = pneg %p1023_p6 }
  0x11   : > { %p832_p9 = pnand %p831_p8, %p830_p7 }
  0x13   : > { %p833_p10 = pneg %p832_p9 }
  0x15   : > { %p838_p12 = pnand %p836_p11, %p833_p10 }
  0x17   : > { %841 = shalt.err (!%p838_p12)
}
  0x18   : > { %s842_s16 = scalar_lea.vmem %s213_s29, 256  ;;  %p850_p2 = scmp.lt.s32.totalorder %s213_s29, %s213_s29 }
  0x19   : > { %p843_p13 = scmp.ne.s32.totalorder %s213_s29, %s842_s16  ;;  %p851_p5 = scmp.lt.s32.totalorder %s842_s16, %s842_s16 }
  0x1b   : > { %p845_p0 = pnand %p843_p13, %p831_p8  ;;  %p852_p4 = por %p851_p5, %p850_p2 }
  0x1d   : > { %p846_p1 = pneg %p845_p0 }
  0x1f   : > { %p853_p3 = pnand %p852_p4, %p846_p1 }
  0x21   : > { %856 = shalt.err (!%p853_p3)
}
  0x22   : > { %s947_s17 = smov 64   ;;  %s948_s18 = smov 4  }
  0x23   : > { %768 = dma.hbm_to_vmem [thread:$0]  (!%p1023_p6), %s1128_s1, 256, %s213_s29, [#allocation8], %s947_s17, %s947_s17, %s948_s18  }
  0x24   : > { %s857_s7 = scalar_lea.hbm %s1131_s4, 1024 }
  0x25   : > { %p858_p3 = scmp.ne.s32.totalorder %s1131_s4, %s857_s7  ;;  %p864_p10 = scmp.lt.u32.totalorder %s857_s7, %s1131_s4 }
  0x27   : > { %p860_p4 = pnand %p858_p3, %p831_p8 }
  0x29   : > { %p861_p9 = pneg %p860_p4 }
  0x2b   : > { %p866_p11 = pnand %p864_p10, %p861_p9 }
  0x2d   : > { %869 = shalt.err (!%p866_p11)
}
  0x2e   : > { %s870_s29 = scalar_lea.vmem %s232_s8, 1024  ;;  %p878_p1 = scmp.lt.s32.totalorder %s232_s8, %s232_s8 }
  0x2f   : > { %p871_p12 = scmp.ne.s32.totalorder %s232_s8, %s870_s29  ;;  %p879_p2 = scmp.lt.s32.totalorder %s870_s29, %s870_s29 }
  0x31   : > { %p873_p13 = pnand %p871_p12, %p831_p8  ;;  %p880_p5 = por %p879_p2, %p878_p1 }
  0x33   : > { %p874_p0 = pneg %p873_p13 }
  0x35   : > { %p881_p7 = pnand %p880_p5, %p874_p0 }
  0x37   : > { %884 = shalt.err (!%p881_p7)
}
  0x38   : > { %771 = dma.hbm_to_vmem [thread:$0]  (!%p1023_p6), %s1131_s4, 1024, %s232_s8, [#allocation8], %s947_s17, %s947_s17, %s948_s18  }
  0x39   : > { %p779_p3 = scmp.eq.s32.totalorder %s943_s23, 0  ;;  %s949_s15 = smov [#allocation5]  }
  0x3a   : > { %s261_s16 = sshll.u32 %s949_s15, 4  ;;  %p1140_p4 = scmp.lt.s32.totalorder %s943_s23, 2  ;;  %s262_s16 = int_to_ptr.vmem [resolvable:$true] %s261_s16 }
  0x3b   : > { %s885_s30 = scalar_lea.hbm %s1127_s0, 128 }
  0x3c   : > { %p1073_p8 = pnand %p779_p3, %p1140_p4  ;;  %p886_p7 = scmp.ne.s32.totalorder %s1127_s0, %s885_s30 }
  0x3d   : > { %p892_p11 = scmp.lt.u32.totalorder %s885_s30, %s1127_s0 }
  0x3e   : > { %p887_p6 = pneg %p1073_p8 }
  0x40   : > { %p888_p9 = pnand %p887_p6, %p886_p7 }
  0x42   : > { %p889_p10 = pneg %p888_p9 }
  0x44   : > { %p894_p12 = pnand %p892_p11, %p889_p10 }
  0x46   : > { %897 = shalt.err (!%p894_p12)
}
  0x47   : > { %s898_s18 = scalar_lea.vmem %s262_s16, 128  ;;  %s905_s9 = scalar_lea.vmem %s262_s16, 256 }
  0x48   : > { %p899_p13 = scmp.ne.s32.totalorder %s262_s16, %s898_s18  ;;  %p906_p2 = scmp.lt.s32.totalorder %s262_s16, %s262_s16 }
  0x49   : > { %p907_p5 = scmp.lt.s32.totalorder %s905_s9, %s898_s18 }
  0x4a   : > { %p901_p0 = pnand %p899_p13, %p887_p6 }
  0x4b   : > { %p908_p3 = por %p907_p5, %p906_p2 }
  0x4c   : > { %p902_p1 = pneg %p901_p0 }
  0x4e   : > { %p909_p4 = pnand %p908_p3, %p902_p1 }
  0x50   : > { %912 = shalt.err (!%p909_p4)
}
  0x51   : > { %775 = dma.hbm_to_vmem [thread:$0]  (!%p1073_p8), %s1127_s0, 128, %s262_s16, [#allocation6]  }
  0x52   : > { %p1142_p7 = scmp.ne.s32.totalorder %s1137_s26, 0 }
  0x53   : > { %p1143_p9 = scmp.ne.s32.totalorder (!%p1142_p7), %s1138_s27, 0 }
  0x54   : > { %270 = sbr.rel (%p1142_p7) target bundleno = 603 (0x25b), region = 44 }
  0x5b   : > { %926 = dma.done.wait (%p1143_p9), [#allocation6], 128  }
  0x5c   : > { %928 = vsyncadd (%p1143_p9), [#allocation6], 4294967168 }
  0x5d   : > { %930 = dma.done.wait (%p1143_p9), [#allocation8], 1280  }
  0x5e   : > { %932 = vsyncadd (%p1143_p9), [#allocation8], 4294966016  ;;  %p322_p6 = scmp.eq.s32.totalorder %s935_s21, 0 }
  0x5f   : > { %v950_v0 = vmov (%p322_p6), 0.0  }
  0x60   : > { %327 = sbr.rel (!%p322_p6) target bundleno = 103 (0x67), region = 60  ;;  %328 = vst [vmem:[#allocation2] sm:$0x1] (%p322_p6), %v950_v0  ;;  %329 = vst [vmem:[#allocation3] sm:$0x1] (%p322_p6), %v950_v0 }
  0x67 PF: > { %p692_p8 = scmp.ne.s32.totalorder %s935_s21, 0 }
  0x68   : > { %v817_v1 = vld [vmem:[#allocation7] sm:$0xff] (!%p692_p8)   ;;  %v951_v2 = vmov (!%p692_p8), 0.0   ;;  %v818_v3 = vld [vmem:[#allocation7 + $0x8] sm:$0xff] (!%p692_p8)   ;;  %vm952_vm0 = vmmov (!%p692_p8), 0   ;;  %v333_v4 = vld [vmem:[#allocation5] sm:$0xff] (!%p692_p8)  ;;  %vm351_vm1 = vcmask (!%p692_p8), 261120  }
  0x69   : > { %332 = sbr.rel (%p692_p8) target bundleno = 342 (0x156), region = 64  ;;  %725 = vmatprep.subr.bf16.mxu0 (!%p692_p8), %v951_v2  ;;  %729 = vmatprep.mubr.msk.bf16.mxu0 (!%p692_p8), %vm952_vm0, %v951_v2  ;;  %v334_v5 = vpack.c.bf16 (!%p692_p8), %v333_v4, %v333_v4  ;;  %v406_v20 = vld [vmem:[#allocation2] sm:$0x1] (!%p692_p8)  ;;  %v415_v23 = vld [vmem:[#allocation3] sm:$0x1] (!%p692_p8) }
  0x6a   : > { %726 = vmatpush3.bf16.msra.mxu0 (!%p692_p8), %v817_v1 }
  0x6b   : > { %727 = vmatprep.subr.bf16.mxu0 (!%p692_p8), %v951_v2 }
  0x6e   : > { %728 = vmatpush3.bf16.msra.mxu0 (!%p692_p8), %v818_v3 }
  0x71   : > { %730 = vmatmul.mubr.msk.bf16.vlgmr.msra.gmra.mrb[0].mxu0 %vm351_vm1, %v334_v5 }
 0x144   : > { %v389_v6 = vpop.f32.mrb[0].mxu0 }
 0x145   : > { %397 = vst [vmem:[#allocation4] sm:$0xff] %v389_v6  ;;  %v407_v7 = vrot.slane %v389_v6, 4  ;;  %v416_v8 = vmul.f32 %v389_v6, %v389_v6  ;;  %v731_v9 = vpop.f32.mrb[1].mxu0 }
 0x146   : > { %v392_v10 = vpop.f32.mrb[2].mxu0 }
 0x147   : > { %v408_v11 = vadd.f32 %v407_v7, %v389_v6  ;;  %v417_v12 = vrot.slane %v416_v8, 4  ;;  %v732_v13 = vpop.f32.mrb[3].mxu0 }
 0x149   : > { %v409_v14 = vrot.slane %v408_v11, 2  ;;  %v418_v15 = vadd.f32 %v417_v12, %v416_v8 }
 0x14b   : > { %v410_v16 = vadd.f32 %v409_v14, %v408_v11  ;;  %v419_v17 = vrot.slane %v418_v15, 2 }
 0x14d   : > { %v411_v18 = vrot.slane %v410_v16, 1  ;;  %v420_v19 = vadd.f32 %v419_v17, %v418_v15 }
 0x14f   : > { %v412_v21 = vadd.f32 %v411_v18, %v410_v16  ;;  %v421_v22 = vrot.slane %v420_v19, 1 }
 0x151   : > { %v413_v24 = vadd.f32 %v412_v21, %v406_v20  ;;  %v422_v25 = vadd.f32 %v421_v22, %v420_v19 }
 0x153   : > { %414 = vst [vmem:[#allocation2] sm:$0x1] %v413_v24  ;;  %v423_v26 = vadd.f32 %v422_v25, %v415_v23 }
 0x155   : > { %424 = vst [vmem:[#allocation3] sm:$0x1] %v423_v26 }
 0x156 PF: > { %p696_p10 = scmp.ne.s32.totalorder %s935_s21, 1 }
 0x157   : > { %v819_v27 = vld [vmem:[#allocation9] sm:$0xff] (!%p696_p10)   ;;  %v953_v28 = vmov (!%p696_p10), 0.0   ;;  %v820_v29 = vld [vmem:[#allocation9 + $0x8] sm:$0xff] (!%p696_p10)   ;;  %vm954_vm2 = vmmov (!%p696_p10), 0   ;;  %v821_v30 = vld [vmem:[#allocation9 + $0x10] sm:$0xff] (!%p696_p10)  }
 0x158   : > { %428 = sbr.rel (%p696_p10) target bundleno = 603 (0x25b), region = 68  ;;  %733 = vmatprep.subr.bf16.mxu0 (!%p696_p10), %v953_v28  ;;  %749 = vmatprep.mubr.msk.bf16.mxu0 (!%p696_p10), %vm954_vm2, %v953_v28  ;;  %v822_v35 = vld [vmem:[#allocation9 + $0x18] sm:$0xff] (!%p696_p10)   ;;  %v823_v38 = vld [vmem:[#allocation9 + $0x20] sm:$0xff] (!%p696_p10)   ;;  %v824_v41 = vld [vmem:[#allocation9 + $0x28] sm:$0xff] (!%p696_p10)  }
 0x159   : > { %734 = vmatpush3.bf16.msra.mxu0 (!%p696_p10), %v819_v27  ;;  %v825_v42 = vld [vmem:[#allocation9 + $0x30] sm:$0xff] (!%p696_p10)   ;;  %v826_v43 = vld [vmem:[#allocation9 + $0x38] sm:$0xff] (!%p696_p10)  }
 0x15a   : > { %735 = vmatprep.subr.bf16.mxu0 (!%p696_p10), %v953_v28  ;;  %v432_v31 = vld [vmem:[#allocation2] sm:$0x1] (!%p696_p10)  ;;  %v450_v50 = vld [vmem:[#allocation4] sm:$0xff] (!%p696_p10) }
 0x15b   : > { %v433_v33 = vmul.f32 (!%p696_p10), 0.125, %v432_v31  ;;  %v439_v44 = vld [vmem:[%s1129_s2] sm:$0x1] (!%p696_p10) }
 0x15c   : > { %v434_v32 = vld [vmem:[#allocation3] sm:$0x1] (!%p696_p10)  ;;  %v444_v47 = vld [vmem:[%s1130_s3] sm:$0x1] (!%p696_p10) }
 0x15d   : > { %736 = vmatpush3.bf16.msra.mxu0 (!%p696_p10), %v820_v29  ;;  %v435_v34 = vmul.f32 (!%p696_p10), 0.125, %v434_v32  ;;  %v436_v36 = vmul.f32 (!%p696_p10), %v433_v33, %v433_v33  ;;  %v699_v57 = vld [vmem:[%s1132_s5] ss:$0 sm:$0xff] (!%p696_p10) }
 0x15e   : > { %737 = vmatprep.subr.bf16.mxu0 (!%p696_p10), %v953_v28 }
 0x15f   : > { %v437_v37 = vsub.f32 %v435_v34, %v436_v36 }
 0x161   : > { %738 = vmatpush3.bf16.msra.mxu0 %v821_v30  ;;  %v438_v39 = vmax.f32 %v437_v37, 0.0 }
 0x162   : > { %739 = vmatprep.subr.bf16.mxu0 %v953_v28 }
 0x163   : > { %v440_v40 = vadd.f32 1e-05, %v438_v39 }
 0x165   : > { %740 = vmatpush3.bf16.msra.mxu0 %v822_v35  ;;  %827 = vrsqrt.f32 %v440_v40 }
 0x166   : > { %741 = vmatprep.subr.bf16.mxu0 %v953_v28 }
 0x169   : > { %742 = vmatpush3.bf16.msra.mxu0 %v823_v38 }
 0x16a   : > { %743 = vmatprep.subr.bf16.mxu0 %v953_v28 }
 0x16d   : > { %744 = vmatpush3.bf16.msra.mxu0 %v824_v41 }
 0x16e   : > { %745 = vmatprep.subr.bf16.mxu0 %v953_v28 }
 0x16f   : > { %v828_v45 = vpop.eup %827 }
 0x170   : > { %v442_v46 = vmul.f32 %v828_v45, %v439_v44 }
 0x171   : > { %746 = vmatpush3.bf16.msra.mxu0 %v825_v42 }
 0x172   : > { %747 = vmatprep.subr.bf16.mxu0 %v953_v28  ;;  %443 = vst [vmem:[#allocation2] sm:$0x1] %v442_v46  ;;  %v445_v48 = vmul.f32 %v442_v46, %v433_v33 }
 0x174   : > { %v446_v49 = vsub.f32 %v444_v47, %v445_v48 }
 0x175   : > { %748 = vmatpush3.bf16.msra.mxu0 %v826_v43 }
 0x176   : > { %447 = vst [vmem:[#allocation3] sm:$0x1] %v446_v49 }
 0x179   : > { %v697_v51 = vld [vmem:[#allocation2] ss:$0 sm:$0xff] }
 0x17a   : > { %v458_v52 = vmul.f32 %v697_v51, %v450_v50 }
 0x17d   : > { %v698_v53 = vld [vmem:[#allocation3] ss:$0 sm:$0xff] }
 0x17e   : > { %v466_v54 = vadd.f32 %v698_v53, %v458_v52 }
 0x180   : > { %v467_v55 = vmax.f32 %v466_v54, 0.0 }
 0x182   : > { %v468_v56 = vpack.c.bf16 %v467_v55, %v467_v55 }
 0x184   : > { %750 = vmatmul.mubr.bf16.vlgmr.msra.gmra.mrb[0].mxu0 %v468_v56 }
 0x257   : > { %v574_v58 = vpop.f32.mrb[0].mxu0 }
 0x258   : > { %v575_v59 = vadd.f32 %v699_v57, %v574_v58  ;;  %v751_v60 = vpop.f32.mrb[1].mxu0 }
 0x259   : > { %v577_v61 = vpop.f32.mrb[2].mxu0 }
 0x25a   : > { %580 = vst [vmem:[%s1133_s6] sm:$0xff] %v575_v59  ;;  %v752_v62 = vpop.f32.mrb[3].mxu0 }
 0x25b PF: > { %s20_s23 = sadd.s32 1, %s943_s23   ;;  %s1144_s21 = smov %s939_s22 }
 0x25c   : > { %p17_p11 = scmp.ge.s32.totalorder %s20_s23, 4   ;;  %s1145_s22 = smov %s1147_s25 }
 0x25e   :  { %19 = sbr.rel (!%p17_p11) target bundleno = 4 (0x4), region = 110 }
 0x265   :  { %603 = vsyncpa [#allocation6], 1 }
 0x266   :  { %605 = vsyncpa [#allocation6 + $0x1], 1 }
 0x267   :  { %606 = vsyncpa [#allocation8], 1 }

</bundles_post_ra>
